<compile_context>
chip_gen: v7x
topology: tpu7x:2x2x1
jax: 0.10.0
libtpu: 0.0.40
codegen_flags: <defaults>
</compile_context>

<pallas_src>
import jax
import jax.numpy as jnp
from jax.experimental import pallas as pl
from jax.experimental.pallas import tpu as pltpu


def _round_up(v, m):
    return ((v + m - 1) // m) * m


def _vmem_budgets():
    """Returns (tile working-set budget, vmem_limit_bytes) per TPU generation."""
    try:
        kind = jax.devices()[0].device_kind.lower()
    except Exception:
        kind = ""
    if ("v5" in kind) or ("v6" in kind):
        # 128 MiB physical VMEM: large tiles amortize per-grid-step overhead.
        return 56 * 1024 * 1024, 96 * 1024 * 1024
    # v7x (64 MiB physical VMEM) and unknown parts: stay conservative and leave
    # headroom for compiler-internal scratch.
    return 26 * 1024 * 1024, 44 * 1024 * 1024


def _pw_resident_kernel(x_ref, wt_ref, b_ref, o_ref):
    # x_ref: (tm, K) streamed rows; wt_ref: (K, N) resident weight;
    # b_ref: (1, N) resident folded bias (f32); o_ref: (tm, N).
    acc = jnp.dot(x_ref[...], wt_ref[...], preferred_element_type=jnp.float32)
    o_ref[...] = (acc - b_ref[...]).astype(o_ref.dtype)


def _pw_tiled_kernel(x_ref, wt_ref, b_ref, o_ref, acc_ref):
    # Large-weight fallback: K is the innermost ("arbitrary") grid axis.
    @pl.when(pl.program_id(2) == 0)
    def _():
        acc_ref[...] = jnp.zeros_like(acc_ref)

    acc_ref[...] += jnp.dot(x_ref[...], wt_ref[...],
                            preferred_element_type=jnp.float32)

    @pl.when(pl.program_id(2) == pl.num_programs(2) - 1)
    def _():
        o_ref[...] = (acc_ref[...] - b_ref[...]).astype(o_ref.dtype)


def pw_layer(x, bias, weight, compute_dtype=None):
    """x: (..., input_size); bias: (input_size,); weight: (output_size, input_size).

    compute_dtype: optionally cast x / weight (e.g. jnp.bfloat16) before the
    matmul to halve HBM traffic; accumulation stays f32 either way.
    """
    orig_shape = x.shape
    K = orig_shape[-1]
    N = weight.shape[0]
    x2d = x.reshape(-1, K)
    M = x2d.shape[0]
    out_dtype = x.dtype

    if compute_dtype is not None:
        x2d = x2d.astype(compute_dtype)
        weight = weight.astype(compute_dtype)

    # One-time transpose of the (small) weight to (K, N): the in-kernel dot is a
    # plain NN contraction, so Mosaic emits no per-tile transposes.
    wt = weight.T

    # Fold the whitening bias into the matmul: (x - b) @ W^T = x @ W^T - (b @ W^T).
    b_row = jnp.dot(bias.astype(jnp.float32), wt.astype(jnp.float32),
                    preferred_element_type=jnp.float32).reshape(1, N)

    budget, vmem_limit = _vmem_budgets()
    x_b = x2d.dtype.itemsize
    w_b = wt.dtype.itemsize
    o_b = jnp.dtype(out_dtype).itemsize

    # ---------- Path A: resident weight (the normal PWLayer regime) ----------
    resident_bytes = K * N * w_b + N * 4          # weight + folded-bias row

    def ws_resident(tm_):
        # double-buffered x / out tiles + resident W/bias + f32 pre-store tile.
        return (resident_bytes
                + 2 * tm_ * K * x_b
                + 2 * tm_ * N * o_b
                + tm_ * N * 4)

    tm = min(1024, _round_up(max(M, 1), 8))
    tm_floor = min(128, _round_up(max(M, 1), 8))   # never starve the MXU rows
    while tm > tm_floor and ws_resident(tm) > budget:
        tm = max(tm_floor, _round_up(tm // 2, 8))

    if ws_resident(tm) <= budget:
        grid = (pl.cdiv(M, tm),)
        out = pl.pallas_call(
            _pw_resident_kernel,
            out_shape=jax.ShapeDtypeStruct((M, N), out_dtype),
            grid=grid,
            in_specs=[
                pl.BlockSpec((tm, K), lambda i: (i, 0)),   # streamed x rows
                pl.BlockSpec((K, N), lambda i: (0, 0)),    # resident weight
                pl.BlockSpec((1, N), lambda i: (0, 0)),    # resident folded bias
            ],
            out_specs=pl.BlockSpec((tm, N), lambda i: (i, 0)),
            compiler_params=pltpu.CompilerParams(
                dimension_semantics=("parallel",),          # megacore on v7x
                vmem_limit_bytes=vmem_limit,
            ),
        )(x2d, wt, b_row)
        return out.reshape(*orig_shape[:-1], N)

    # ---------- Path B: large weight -> (M, N, K) grid with accumulator ------
    tm = min(256, _round_up(max(M, 1), 8))
    tn = min(256, _round_up(N, 128))

    def ws_tiled(tk_):
        return (2 * tm * tk_ * x_b + 2 * tk_ * tn * w_b
                + 2 * tm * tn * o_b + tm * tn * 4 + 2 * tn * 4)

    tk = min(2048, _round_up(K, 128))
    while tk > 128 and ws_tiled(tk) > budget:
        tk -= 128

    # Zero-pad K (required for a correct accumulation over padded edge blocks)
    # and N of the weight / folded bias; the output itself stays unpadded.
    Kpad = _round_up(K, tk)
    Npad = _round_up(N, tn)
    if Kpad != K:
        x2d = jnp.pad(x2d, ((0, 0), (0, Kpad - K)))
        wt = jnp.pad(wt, ((0, Kpad - K), (0, 0)))
    if Npad != N:
        wt = jnp.pad(wt, ((0, 0), (0, Npad - N)))
        b_row = jnp.pad(b_row, ((0, 0), (0, Npad - N)))

    grid = (pl.cdiv(M, tm), Npad // tn, Kpad // tk)
    out = pl.pallas_call(
        _pw_tiled_kernel,
        out_shape=jax.ShapeDtypeStruct((M, N), out_dtype),
        grid=grid,
        in_specs=[
            pl.BlockSpec((tm, tk), lambda i, j, k: (i, k)),
            pl.BlockSpec((tk, tn), lambda i, j, k: (k, j)),
            pl.BlockSpec((1, tn), lambda i, j, k: (0, j)),
        ],
        out_specs=pl.BlockSpec((tm, tn), lambda i, j, k: (i, j)),
        scratch_shapes=[pltpu.VMEM((tm, tn), jnp.float32)],
        compiler_params=pltpu.CompilerParams(
            dimension_semantics=("parallel", "parallel", "arbitrary"),
            vmem_limit_bytes=vmem_limit,
        ),
    )(x2d, wt, b_row)
    return out.reshape(*orig_shape[:-1], N)


if __name__ == "__main__":
    # Small shapes implied by the module: token features (batch, seq, input_size).
    batch, seq, input_size, output_size = 2, 8, 32, 64

    key = jax.random.PRNGKey(0)
    kx, kw, kb = jax.random.split(key, 3)

    x = jax.random.normal(kx, (batch, seq, input_size), dtype=jnp.float32)

    # Parameters matching PWLayer: bias (input_size,), weight ~ N(0, 0.02).
    # bias initializes to zeros in PyTorch; use a small non-zero value here
    # (as a trained parameter would be) so the whitening path is exercised.
    bias = 0.1 * jax.random.normal(kb, (input_size,), dtype=jnp.float32)
    weight = 0.02 * jax.random.normal(kw, (output_size, input_size), dtype=jnp.float32)

    y = pw_layer(x, bias, weight)
    y = jax.block_until_ready(y)

    # Reference (plain JAX): lin(dropout(x) - bias), dropout p=0.0 is identity.
    y_ref = jnp.einsum("bsk,nk->bsn", x - bias[None, None, :], weight)
    assert y.shape == (batch, seq, output_size)
    assert jnp.allclose(y, y_ref, atol=1e-5, rtol=1e-5)

    print("KERNEL_OK")
</pallas_src>

<mosaic_0001>
module attributes {stable_mosaic.version = 11 : i64} {
  func.func @_pw_resident_kernel(%arg0: i32, %arg1: memref<16x32xf32, #tpu.memory_space<vmem>>, %arg2: memref<32x64xf32, #tpu.memory_space<vmem>>, %arg3: memref<1x64xf32, #tpu.memory_space<vmem>>, %arg4: memref<16x64xf32, #tpu.memory_space<vmem>>) attributes {dimension_semantics = [#tpu.dimension_semantics<parallel>], iteration_bounds = array<i64: 1>, scalar_prefetch = 0 : i64, scratch_operands = 0 : i64, tpu.core_type = #tpu.core_type<tc>, window_params = [{transform_indices = @transform_0, window_bounds = array<i64: 16, 32>}, {pipeline_mode = #tpu.pipeline_mode<synchronous>, transform_indices = @transform_1, window_bounds = array<i64: 32, 64>}, {pipeline_mode = #tpu.pipeline_mode<synchronous>, transform_indices = @transform_2, window_bounds = array<i64: 1, 64>}, {transform_indices = @transform_3, window_bounds = array<i64: 16, 64>}]} {
    %c0 = arith.constant 0 : index
    %c0_0 = arith.constant 0 : index
    %0 = vector.load %arg1[%c0, %c0_0] : memref<16x32xf32, #tpu.memory_space<vmem>>, vector<16x32xf32>
    %c0_1 = arith.constant 0 : index
    %c0_2 = arith.constant 0 : index
    %1 = vector.load %arg2[%c0_1, %c0_2] : memref<32x64xf32, #tpu.memory_space<vmem>>, vector<32x64xf32>
    %cst = arith.constant dense<0.000000e+00> : vector<16x64xf32>
    %2 = tpu.matmul %0, %1, %cst {dimension_numbers = #tpu.dot_dimension_numbers<[1], [0], [0], [1], [0, 0, 1, 1], [], []>} : vector<16x32xf32>, vector<32x64xf32>, vector<16x64xf32> -> vector<16x64xf32>
    %c0_3 = arith.constant 0 : index
    %c0_4 = arith.constant 0 : index
    %3 = vector.load %arg3[%c0_3, %c0_4] : memref<1x64xf32, #tpu.memory_space<vmem>>, vector<1x64xf32>
    %4 = vector.broadcast %3 : vector<1x64xf32> to vector<16x64xf32>
    %5 = arith.subf %2, %4 : vector<16x64xf32>
    %c0_5 = arith.constant 0 : index
    %c0_6 = arith.constant 0 : index
    %6 = vector.load %arg4[%c0_5, %c0_6] : memref<16x64xf32, #tpu.memory_space<vmem>>, vector<16x64xf32>
    tpu.vector_store %arg4[%c0_5, %c0_6], %5 {strides = array<i32>} : memref<16x64xf32, #tpu.memory_space<vmem>>, vector<16x64xf32>,
    return
  }
  func.func @transform_0(%arg0: i32) -> (i32, i32) {
    %c0_i32 = arith.constant 0 : i32
    %c0_i32_0 = arith.constant 0 : i32
    return %arg0, %c0_i32 : i32, i32
  }
  func.func @transform_1(%arg0: i32) -> (i32, i32) {
    %c0_i32 = arith.constant 0 : i32
    %c0_i32_0 = arith.constant 0 : i32
    %c0_i32_1 = arith.constant 0 : i32
    return %c0_i32, %c0_i32_0 : i32, i32
  }
  func.func @transform_2(%arg0: i32) -> (i32, i32) {
    %c0_i32 = arith.constant 0 : i32
    %c0_i32_0 = arith.constant 0 : i32
    %c0_i32_1 = arith.constant 0 : i32
    return %c0_i32, %c0_i32_0 : i32, i32
  }
  func.func @transform_3(%arg0: i32) -> (i32, i32) {
    %c0_i32 = arith.constant 0 : i32
    %c0_i32_0 = arith.constant 0 : i32
    return %arg0, %c0_i32 : i32, i32
  }
}

</mosaic_0001>

<bundles_post_ra>
// kernel: tpu_custom_call.1
= control target key start
LH: loop header
LB: loop body
LE: loop exit
PB: predicated region body
PF: predicated region fallthrough
CT: control target
= control target key end

     0   :  { %8 = vsyncpa [#allocation3], 0  ;;  %s339_s0 = inlined_call_operand.hbm [shape: f32[16,32], index: 0, kind: input, shape index: {}]   ;;  %s340_s1 = inlined_call_operand.hbm [shape: f32[32,64], index: 1, kind: input, shape index: {}]   ;;  %s341_s2 = inlined_call_operand.vmem [shape: f32[1,64], index: 2, kind: input, shape index: {}]   ;;  %s342_s3 = inlined_call_operand.hbm [shape: f32[16,64], index: 3, kind: output, shape index: {}]  }
   0x1   :  { %9 = vsyncpa [#allocation6], 0 }
   0x2   :  { %10 = vsyncpa [#allocation4], 0  ;;  %s266_s12 = smov [#allocation2]   ;;  %s194_s16 = scalar_lea.hbm %s339_s0, 256 }
   0x3   :  { %s16_s13 = sshll.u32 %s266_s12, 4  ;;  %p195_p0 = scmp.ne.s32.totalorder %s339_s0, %s194_s16  ;;  %s17_s13 = int_to_ptr.vmem [resolvable:$true] %s16_s13 }
   0x4   :  { %p198_p1 = scmp.lt.u32.totalorder %s194_s16, %s339_s0 }
   0x6   :  { %p200_p2 = pnand %p198_p1, %p195_p0 }
   0x8   :  { %203 = shalt.err (!%p200_p2)
}
   0x9   :  { %s204_s21 = scalar_lea.vmem %s17_s13, 256  ;;  %p209_p4 = scmp.lt.s32.totalorder %s17_s13, %s17_s13 }
   0xa   :  { %p205_p3 = scmp.ne.s32.totalorder %s17_s13, %s204_s21  ;;  %p210_p5 = scmp.lt.s32.totalorder %s204_s21, %s204_s21 }
   0xc   :  { %p211_p6 = por %p210_p5, %p209_p4 }
   0xe   :  { %p212_p7 = pnand %p211_p6, %p205_p3 }
  0x10   :  { %215 = shalt.err (!%p212_p7)
}
  0x11   :  { %s267_s22 = smov 128   ;;  %s268_s23 = smov 8  }
  0x12   :  { %22 = dma.hbm_to_vmem [thread:$0]  %s339_s0, 256, %s17_s13, [#allocation3], %s267_s22, %s267_s22, %s268_s23  }
  0x13   :  { %s269_s26 = smov [#allocation5]   ;;  %s216_s30 = scalar_lea.hbm %s340_s1, 512 }
  0x14   :  { %s28_s27 = sshll.u32 %s269_s26, 4  ;;  %p217_p8 = scmp.ne.s32.totalorder %s340_s1, %s216_s30  ;;  %s29_s27 = int_to_ptr.vmem [resolvable:$true] %s28_s27 }
  0x15   :  { %p220_p9 = scmp.lt.u32.totalorder %s216_s30, %s340_s1 }
  0x17   :  { %p222_p10 = pnand %p220_p9, %p217_p8 }
  0x19   :  { %225 = shalt.err (!%p222_p10)
}
  0x1a   :  { %s226_s8 = scalar_lea.vmem %s29_s27, 512  ;;  %p231_p12 = scmp.lt.s32.totalorder %s29_s27, %s29_s27 }
  0x1b   :  { %p227_p11 = scmp.ne.s32.totalorder %s29_s27, %s226_s8  ;;  %p232_p13 = scmp.lt.s32.totalorder %s226_s8, %s226_s8 }
  0x1d   :  { %p233_p0 = por %p232_p13, %p231_p12 }
  0x1f   :  { %p234_p1 = pnand %p233_p0, %p227_p11 }
  0x21   :  { %237 = shalt.err (!%p234_p1)
}
  0x22   :  { %34 = dma.hbm_to_vmem [thread:$0]  %s340_s1, 512, %s29_s27, [#allocation6], %s267_s22, %s267_s22, %s268_s23  }
  0x23   :  { %260 = dma.done.wait [#allocation3], 256  }
  0x24   :  { %261 = vsyncadd [#allocation3], 4294967040 }
  0x25   :  { %262 = dma.done.wait [#allocation6], 512  }
  0x26   :  { %263 = vsyncadd [#allocation6], 4294966784  ;;  %vm49_vm0 = vcmask 261120   ;;  %v45_v0 = vld [vmem:[#allocation5] sm:$0xff]  ;;  %v46_v1 = vld [vmem:[#allocation5 + $0x8] sm:$0xff]  ;;  %s270_s11 = smov [#allocation7]  }
  0x27   :  { %v47_v2 = vld [vmem:[#allocation5 + $0x10] sm:$0xff]  ;;  %v181_v3 = vpack.c.bf16 %v46_v1, %v45_v0  ;;  %v48_v4 = vld [vmem:[#allocation5 + $0x18] sm:$0xff]  ;;  %s148_s12 = sshll.u32 %s270_s11, 4  ;;  %vm140_vm1 = vcmask 523264   ;;  %s149_s12 = int_to_ptr.vmem [resolvable:$true] %s148_s12 }
  0x28   :  { %v43_v5 = vld [vmem:[#allocation2] sm:$0xff]  ;;  %v185_v6 = vpack.c.bf16 %v48_v4, %v47_v2  ;;  %v44_v7 = vld [vmem:[#allocation2 + $0x8] sm:$0xff]  ;;  %s238_s13 = scalar_lea.vmem %s149_s12, 256  ;;  %p243_p3 = scmp.lt.s32.totalorder %s149_s12, %s149_s12 }
  0x29   :  { %178 = vmatprep.mubr.msk.f32.mxu0 %vm49_vm0, %v43_v5  ;;  %182 = vmatprep.subr.bf16.mxu0 %v181_v3  ;;  %v163_v8 = vld [vmem:[%s341_s2] ss:$0 sm:$0xff]  ;;  %p239_p2 = scmp.ne.s32.totalorder %s149_s12, %s238_s13  ;;  %p244_p4 = scmp.lt.s32.totalorder %s238_s13, %s238_s13 }
  0x2a   :  { %184 = vmatpush3.bf16.msra.mxu0 %v181_v3 }
  0x2b   :  { %186 = vmatprep.subr.bf16.mxu0 %v185_v6  ;;  %p245_p5 = por %p244_p4, %p243_p3 }
  0x2d   :  { %p246_p6 = pnand %p245_p5, %p239_p2 }
  0x2e   :  { %188 = vmatpush3.bf16.msra.mxu0 %v185_v6 }
  0x31   :  { %179 = vmatmul.mubr.msk.f32.vlgmr.msra.gmra.mrb[0].mxu0 %vm49_vm0, %v44_v7 }
 0x104   :  { %v180_v9 = vpop.f32.mrb[0].mxu0 }
 0x105   :  { %v139_v10 = vsub.f32 %v180_v9, %v163_v8  ;;  %v122_v11 = vpop.f32.mrb[1].mxu0 }
 0x106   :  { %v138_v12 = vsub.f32 %v122_v11, %v163_v8 }
 0x107   :  { %142 = vst.msk [vmem:[#allocation7 + $0x8] sm:$0xff] %vm140_vm1, %v139_v10 }
 0x108   :  { %141 = vst.msk [vmem:[#allocation7] sm:$0xff] %vm140_vm1, %v138_v12 }
 0x109   :  { %249 = shalt.err (!%p246_p6)
}
 0x10a   :  { %s250_s2 = scalar_lea.hbm %s342_s3, 256 }
 0x10b   :  { %p251_p7 = scmp.ne.s32.totalorder %s342_s3, %s250_s2  ;;  %p254_p8 = scmp.lt.u32.totalorder %s250_s2, %s342_s3 }
 0x10d   :  { %p256_p9 = pnand %p254_p8, %p251_p7 }
 0x10f   :  { %259 = shalt.err (!%p256_p9)
}
 0x110   :  { %154 = dma.vmem_to_hbm [thread:$0]  %s149_s12, 256, %s342_s3, [#allocation4], %s267_s22, %s267_s22, %s268_s23  }
 0x111   :  { %264 = dma.done.wait [#allocation4], 256  }
 0x112   :  { %265 = vsyncadd [#allocation4], 4294967040 }
 0x113   :  { %158 = vsyncpa [#allocation3], 1 }
 0x114   :  { %159 = vsyncpa [#allocation6], 1 }
 0x115   :  { %160 = vsyncpa [#allocation4], 1 }

</bundles_post_ra>
